<compile_context>
chip_gen: v7x
topology: tpu7x:2x2x1
jax: 0.10.0
libtpu: 0.0.40
codegen_flags: <defaults>
</compile_context>

<pallas_src>
import jax
import jax.numpy as jnp
from jax.experimental import pallas as pl
from jax.experimental.pallas import tpu as pltpu


# ---------------------------------------------------------------------------
# Kernels
# ---------------------------------------------------------------------------
def _rnnode_cell_kernel(x_ref, h_ref, wx_ref, wh_ref, b_ref, o_ref):
    """One RNNODE cell: o = tanh(h @ Wh^T + x @ Wx^T + b) (weights pre-T'd)."""
    acc = jnp.dot(h_ref[...], wh_ref[...], preferred_element_type=jnp.float32)
    if x_ref.shape[1] == 1:
        # input_dim == 1: broadcast multiply-add on the VPU instead of a
        # 1-deep (misaligned) MXU contraction.
        acc = acc + x_ref[...].astype(jnp.float32) * wx_ref[...].astype(jnp.float32)
    else:
        acc = acc + jnp.dot(x_ref[...], wx_ref[...],
                            preferred_element_type=jnp.float32)
    o_ref[...] = jnp.tanh(acc + b_ref[...].astype(jnp.float32)).astype(o_ref.dtype)


def _rnnode_fused_kernel(x_ref, h0_ref, wx_ref, wh_ref, b_ref, hT_ref, h_sc):
    """Iterated cell.  Grid axis 0 = time step; weights/bias are VMEM-resident
    (constant index_map), the hidden state lives in a float32 VMEM scratch and
    only the final state is written back to HBM at the last step."""
    step = pl.program_id(0)

    @pl.when(step == 0)
    def _():
        h_sc[...] = h0_ref[...].astype(jnp.float32)

    acc = jnp.dot(h_sc[...], wh_ref[...], preferred_element_type=jnp.float32)
    if x_ref.shape[-1] == 1:
        acc = acc + x_ref[...].astype(jnp.float32) * wx_ref[...].astype(jnp.float32)
    else:
        acc = acc + jnp.dot(x_ref[...], wx_ref[...],
                            preferred_element_type=jnp.float32)
    h_new = jnp.tanh(acc + b_ref[...].astype(jnp.float32))
    h_sc[...] = h_new

    @pl.when(step == pl.num_programs(0) - 1)
    def _():
        hT_ref[...] = h_new.astype(hT_ref.dtype)


# ---------------------------------------------------------------------------
# Parameter prep (done once, never in the per-call hot path)
# ---------------------------------------------------------------------------
def prepare_rnnode_params(weight, bias, input_dim):
    """Split + transpose nn.Linear params once.

    weight: (n_hidden, input_dim + n_latent), bias: (n_hidden,)
    returns (wx_t: (input_dim, n_hidden), wh_t: (n_latent, n_hidden),
             b2:   (1, n_hidden))
    """
    wx_t = jnp.transpose(weight[:, :input_dim])
    wh_t = jnp.transpose(weight[:, input_dim:])
    b2 = bias.reshape(1, -1)
    return wx_t, wh_t, b2


def _padded_batch(b):
    return max(8, ((b + 7) // 8) * 8)


def _pad_rows(a, rows):
    if a.shape[0] == rows:
        return a
    return jnp.pad(a, ((0, rows - a.shape[0]),) + ((0, 0),) * (a.ndim - 1))


# ---------------------------------------------------------------------------
# Wrappers
# ---------------------------------------------------------------------------
def rnnode_forward(t, h, x, params):
    """Exact RNNODE.forward(t, h, x): tanh(fc1(cat([x, h], dim=1)))."""
    del t  # unused, as in the reference module
    wx_t, wh_t, b2 = params
    B, _ = x.shape
    n_hidden = wh_t.shape[1]

    bp = _padded_batch(B)          # pad batch to a sublane multiple (>= 8)
    x_p = _pad_rows(x, bp)
    h_p = _pad_rows(h, bp)

    # No grid: all operands are small; whole arrays are placed in VMEM.
    out = pl.pallas_call(
        _rnnode_cell_kernel,
        out_shape=jax.ShapeDtypeStruct((bp, n_hidden), x.dtype),
    )(x_p, h_p, wx_t, wh_t, b2)
    return out[:B]


def rnnode_forward_fused(h0, xs, params):
    """Apply the RNNODE cell over xs[0..T-1] inside ONE pallas_call:
         h_{k+1} = tanh(fc1(cat([xs[k], h_k], dim=1)))
    Weights/bias are DMA'd into VMEM once; h never round-trips HBM.
    Requires n_hidden == n_latent (true for the default module config).
    xs: (n_steps, B, input_dim), h0: (B, n_latent) -> final (B, n_hidden)."""
    wx_t, wh_t, b2 = params
    n_steps, B, input_dim = xs.shape
    n_latent = h0.shape[1]
    n_hidden = wh_t.shape[1]
    assert n_hidden == n_latent, "fused stepping needs n_hidden == n_latent"

    bp = _padded_batch(B)
    if B != bp:
        xs = jnp.pad(xs, ((0, 0), (0, bp - B), (0, 0)))
    h0_p = _pad_rows(h0, bp)

    out = pl.pallas_call(
        _rnnode_fused_kernel,
        out_shape=jax.ShapeDtypeStruct((bp, n_hidden), h0.dtype),
        grid_spec=pltpu.PrefetchScalarGridSpec(
            num_scalar_prefetch=0,
            grid=(n_steps,),
            in_specs=[
                # per-step x slice (step dim squeezed out of the kernel ref)
                pl.BlockSpec((None, bp, input_dim), lambda s: (s, 0, 0)),
                # everything below: constant index_map -> VMEM-resident
                pl.BlockSpec((bp, n_latent), lambda s: (0, 0)),
                pl.BlockSpec((input_dim, n_hidden), lambda s: (0, 0)),
                pl.BlockSpec((n_latent, n_hidden), lambda s: (0, 0)),
                pl.BlockSpec((1, n_hidden), lambda s: (0, 0)),
            ],
            out_specs=pl.BlockSpec((bp, n_hidden), lambda s: (0, 0)),
            scratch_shapes=[pltpu.VMEM((bp, n_hidden), jnp.float32)],
        ),
        compiler_params=pltpu.CompilerParams(
            dimension_semantics=("arbitrary",)),  # sequential recurrence
    )(xs, h0_p, wx_t, wh_t, b2)
    return out[:B]


def init_rnnode_params(key, input_dim=1, n_latent=128, n_hidden=128,
                       dtype=jnp.float32):
    """Deterministic init matching nn.Linear's shapes (uniform +/- 1/sqrt(fan_in))."""
    in_features = input_dim + n_latent
    kw, kb = jax.random.split(key)
    bound = 1.0 / jnp.sqrt(jnp.asarray(in_features, dtype))
    weight = jax.random.uniform(kw, (n_hidden, in_features), dtype,
                                minval=-bound, maxval=bound)
    bias = jax.random.uniform(kb, (n_hidden,), dtype,
                              minval=-bound, maxval=bound)
    return weight, bias


if __name__ == "__main__":
    input_dim, n_latent, n_hidden = 1, 128, 128
    batch = 2

    key = jax.random.PRNGKey(0)
    k_params, k_x, k_h, k_xs = jax.random.split(key, 4)

    weight, bias = init_rnnode_params(k_params, input_dim, n_latent, n_hidden)
    params = prepare_rnnode_params(weight, bias, input_dim)  # once, not per call

    x = jax.random.normal(k_x, (batch, input_dim), jnp.float32)
    h = jax.random.normal(k_h, (batch, n_latent), jnp.float32)
    t = jnp.float32(0.0)  # unused by forward, kept for signature parity

    # --- single cell: exact module semantics -------------------------------
    out = jax.block_until_ready(rnnode_forward(t, h, x, params))
    ref = jnp.tanh(jnp.concatenate([x, h], axis=1) @ weight.T + bias)
    assert out.shape == (batch, n_hidden)
    assert jnp.allclose(out, ref, atol=1e-5, rtol=1e-5), (
        float(jnp.max(jnp.abs(out - ref))))

    # --- fused multi-step: same cell math, one pallas_call, W resident -----
    n_steps = 8
    xs = jax.random.normal(k_xs, (n_steps, batch, input_dim), jnp.float32)
    out_fused = jax.block_until_ready(rnnode_forward_fused(h, xs, params))
    ref_h = h
    for k in range(n_steps):
        ref_h = jnp.tanh(
            jnp.concatenate([xs[k], ref_h], axis=1) @ weight.T + bias)
    assert out_fused.shape == (batch, n_hidden)
    assert jnp.allclose(out_fused, ref_h, atol=1e-4, rtol=1e-4), (
        float(jnp.max(jnp.abs(out_fused - ref_h))))

    print("KERNEL_OK")
</pallas_src>

<mosaic_0001>
module attributes {stable_mosaic.version = 11 : i64} {
  func.func @_rnnode_cell_kernel(%arg0: memref<8x1xf32, #tpu.memory_space<vmem>>, %arg1: memref<8x128xf32, #tpu.memory_space<vmem>>, %arg2: memref<1x128xf32, #tpu.memory_space<vmem>>, %arg3: memref<128x128xf32, #tpu.memory_space<vmem>>, %arg4: memref<1x128xf32, #tpu.memory_space<vmem>>, %arg5: memref<8x128xf32, #tpu.memory_space<vmem>>) attributes {dimension_semantics = [], scalar_prefetch = 0 : i64, scratch_operands = 0 : i64, tpu.core_type = #tpu.core_type<tc>} {
    %c0 = arith.constant 0 : index
    %c0_0 = arith.constant 0 : index
    %0 = vector.load %arg1[%c0, %c0_0] : memref<8x128xf32, #tpu.memory_space<vmem>>, vector<8x128xf32>
    %c0_1 = arith.constant 0 : index
    %c0_2 = arith.constant 0 : index
    %1 = vector.load %arg3[%c0_1, %c0_2] : memref<128x128xf32, #tpu.memory_space<vmem>>, vector<128x128xf32>
    %cst = arith.constant dense<0.000000e+00> : vector<8x128xf32>
    %2 = tpu.matmul %0, %1, %cst {dimension_numbers = #tpu.dot_dimension_numbers<[1], [0], [0], [1], [0, 0, 1, 1], [], []>} : vector<8x128xf32>, vector<128x128xf32>, vector<8x128xf32> -> vector<8x128xf32>
    %c0_3 = arith.constant 0 : index
    %c0_4 = arith.constant 0 : index
    %3 = vector.load %arg0[%c0_3, %c0_4] : memref<8x1xf32, #tpu.memory_space<vmem>>, vector<8x1xf32>
    %c0_5 = arith.constant 0 : index
    %c0_6 = arith.constant 0 : index
    %4 = vector.load %arg2[%c0_5, %c0_6] : memref<1x128xf32, #tpu.memory_space<vmem>>, vector<1x128xf32>
    %5 = vector.broadcast %3 : vector<8x1xf32> to vector<8x128xf32>
    %6 = vector.broadcast %4 : vector<1x128xf32> to vector<8x128xf32>
    %7 = arith.mulf %5, %6 : vector<8x128xf32>
    %8 = arith.addf %2, %7 : vector<8x128xf32>
    %c0_7 = arith.constant 0 : index
    %c0_8 = arith.constant 0 : index
    %9 = vector.load %arg4[%c0_7, %c0_8] : memref<1x128xf32, #tpu.memory_space<vmem>>, vector<1x128xf32>
    %10 = vector.broadcast %9 : vector<1x128xf32> to vector<8x128xf32>
    %11 = arith.addf %8, %10 : vector<8x128xf32>
    %12 = math.tanh %11 : vector<8x128xf32>
    %c0_9 = arith.constant 0 : index
    %c0_10 = arith.constant 0 : index
    %13 = vector.load %arg5[%c0_9, %c0_10] : memref<8x128xf32, #tpu.memory_space<vmem>>, vector<8x128xf32>
    tpu.vector_store %arg5[%c0_9, %c0_10], %12 {strides = array<i32>} : memref<8x128xf32, #tpu.memory_space<vmem>>, vector<8x128xf32>,
    return
  }
}

</mosaic_0001>

<bundles_post_ra>
// kernel: tpu_custom_call.1
= control target key start
LH: loop header
LB: loop body
LE: loop exit
PB: predicated region body
PF: predicated region fallthrough
CT: control target
= control target key end

     0   :  { %10 = vsyncpa [#allocation3], 0  ;;  %s372_s0 = inlined_call_operand.vmem [shape: f32[8,1], index: 0, kind: input, shape index: {}]   ;;  %s373_s1 = inlined_call_operand.vmem [shape: f32[8,128], index: 1, kind: input, shape index: {}]   ;;  %s374_s2 = inlined_call_operand.vmem [shape: f32[1,128], index: 2, kind: input, shape index: {}]   ;;  %s375_s3 = inlined_call_operand.hbm [shape: f32[128,128], index: 3, kind: input, shape index: {}]   ;;  %s376_s4 = inlined_call_operand.vmem [shape: f32[1,128], index: 4, kind: input, shape index: {}]   ;;  %s377_s5 = inlined_call_operand.hbm [shape: f32[8,128], index: 5, kind: output, shape index: {}]  }
   0x1   :  { %11 = vsyncpa [#allocation4], 0  ;;  %s298_s18 = smov [#allocation2]   ;;  %s250_s22 = scalar_lea.hbm %s375_s3, 2048 }
   0x2   :  { %s23_s19 = sshll.u32 %s298_s18, 4  ;;  %p251_p0 = scmp.ne.s32.totalorder %s375_s3, %s250_s22  ;;  %s24_s19 = int_to_ptr.vmem [resolvable:$true] %s23_s19 }
   0x3   :  { %p254_p1 = scmp.lt.u32.totalorder %s250_s22, %s375_s3 }
   0x5   :  { %p256_p2 = pnand %p254_p1, %p251_p0 }
   0x7   :  { %259 = shalt.err (!%p256_p2)
}
   0x8   :  { %s260_s27 = scalar_lea.vmem %s24_s19, 2048  ;;  %p265_p4 = scmp.lt.s32.totalorder %s24_s19, %s24_s19 }
   0x9   :  { %p261_p3 = scmp.ne.s32.totalorder %s24_s19, %s260_s27  ;;  %p266_p5 = scmp.lt.s32.totalorder %s260_s27, %s260_s27 }
   0xb   :  { %p267_p6 = por %p266_p5, %p265_p4 }
   0xd   :  { %p268_p7 = pnand %p267_p6, %p261_p3 }
   0xf   :  { %271 = shalt.err (!%p268_p7)
}
  0x10   :  { %s299_s28 = smov 128   ;;  %s300_s29 = smov 8  }
  0x11   :  { %29 = dma.hbm_to_vmem [thread:$0]  %s375_s3, 2048, %s24_s19, [#allocation3], %s299_s28, %s299_s28, %s300_s29  }
  0x12   :  { %294 = dma.done.wait [#allocation3], 2048  }
  0x13   :  { %295 = vsyncadd [#allocation3], 4294965248  ;;  %v301_v0 = vmov 0.0|0.0   ;;  %vm302_vm0 = vmmov 0   ;;  %v303_v1 = vmov 0.0   ;;  %v304_v2 = vmov 0  }
  0x14   :  { %215 = vmatprep.subr.bf16.mxu0 %v301_v0  ;;  %212 = vmatprep.mubr.msk.f32.mxu0 %vm302_vm0, %v303_v1  ;;  %v36_v3 = vld [vmem:[#allocation2] sm:$0xff]  ;;  %v37_v4 = vld [vmem:[#allocation2 + $0x8] sm:$0xff]  ;;  %v38_v5 = vld [vmem:[#allocation2 + $0x10] sm:$0xff]  ;;  %s305_s13 = smov [#allocation5]  }
  0x15   :  { %247 = vset.pattern.permute.xlu0 %v304_v2  ;;  %v216_v6 = vpack.c.bf16 %v37_v4, %v36_v3  ;;  %v39_v7 = vld [vmem:[#allocation2 + $0x18] sm:$0xff]  ;;  %v40_v9 = vld [vmem:[#allocation2 + $0x20] sm:$0xff]  ;;  %v41_v10 = vld [vmem:[#allocation2 + $0x28] sm:$0xff]  ;;  %s152_s14 = sshll.u32 %s305_s13, 4  ;;  %s153_s14 = int_to_ptr.vmem [resolvable:$true] %s152_s14 }
  0x16   :  { %v219_v8 = vpack.c.bf16 %v39_v7, %v38_v5  ;;  %v52_v11 = vld [vmem:[%s372_s0] sm:$0xff]  ;;  %v222_v12 = vpack.c.bf16 %v41_v10, %v40_v9  ;;  %v42_v13 = vld [vmem:[#allocation2 + $0x30] sm:$0xff]  ;;  %v44_v16 = vld [vmem:[#allocation2 + $0x40] sm:$0xff]  ;;  %p277_p9 = scmp.lt.s32.totalorder %s153_s14, %s153_s14 }
  0x17   :  { %217 = vmatpush3.bf16.msra.mxu0 %v216_v6  ;;  %56 = vperm.xlu0 %247, %v52_v11   ;;  %v43_v14 = vld [vmem:[#allocation2 + $0x38] sm:$0xff]  ;;  %v45_v17 = vld [vmem:[#allocation2 + $0x48] sm:$0xff]  ;;  %v46_v19 = vld [vmem:[#allocation2 + $0x50] sm:$0xff] }
  0x18   :  { %218 = vmatprep.subr.bf16.mxu0 %v301_v0  ;;  %v225_v15 = vpack.c.bf16 %v43_v14, %v42_v13  ;;  %v228_v18 = vpack.c.bf16 %v45_v17, %v44_v16  ;;  %v47_v20 = vld [vmem:[#allocation2 + $0x58] sm:$0xff]  ;;  %v48_v22 = vld [vmem:[#allocation2 + $0x60] sm:$0xff]  ;;  %v49_v23 = vld [vmem:[#allocation2 + $0x68] sm:$0xff] }
  0x19   :  { %v231_v21 = vpack.c.bf16 %v47_v20, %v46_v19  ;;  %v234_v24 = vpack.c.bf16 %v49_v23, %v48_v22  ;;  %v50_v25 = vld [vmem:[#allocation2 + $0x70] sm:$0xff]  ;;  %v51_v26 = vld [vmem:[#allocation2 + $0x78] sm:$0xff] }
  0x1a   :  { %v237_v27 = vpack.c.bf16 %v51_v26, %v50_v25  ;;  %v35_v28 = vld [vmem:[%s373_s1] sm:$0xff]  ;;  %s272_s1 = scalar_lea.vmem %s153_s14, 128 }
  0x1b   :  { %220 = vmatpush3.bf16.msra.mxu0 %v219_v8  ;;  %v161_v29 = vld [vmem:[%s374_s2] ss:$0 sm:$0xff]  ;;  %p273_p8 = scmp.ne.s32.totalorder %s153_s14, %s272_s1  ;;  %p278_p10 = scmp.lt.s32.totalorder %s272_s1, %s272_s1 }
  0x1c   :  { %221 = vmatprep.subr.bf16.mxu0 %v301_v0  ;;  %v162_v33 = vld [vmem:[%s376_s4] ss:$0 sm:$0xff] }
  0x1d   :  { %p279_p11 = por %p278_p10, %p277_p9 }
  0x1f   :  { %223 = vmatpush3.bf16.msra.mxu0 %v222_v12  ;;  %p280_p12 = pnand %p279_p11, %p273_p8 }
  0x20   :  { %224 = vmatprep.subr.bf16.mxu0 %v301_v0 }
  0x23   :  { %226 = vmatpush3.bf16.msra.mxu0 %v225_v15 }
  0x24   :  { %227 = vmatprep.subr.bf16.mxu0 %v301_v0 }
  0x27   :  { %229 = vmatpush3.bf16.msra.mxu0 %v228_v18 }
  0x28   :  { %230 = vmatprep.subr.bf16.mxu0 %v301_v0 }
  0x2b   :  { %232 = vmatpush3.bf16.msra.mxu0 %v231_v21 }
  0x2c   :  { %233 = vmatprep.subr.bf16.mxu0 %v301_v0 }
  0x2f   :  { %235 = vmatpush3.bf16.msra.mxu0 %v234_v24 }
  0x30   :  { %236 = vmatprep.subr.bf16.mxu0 %v301_v0 }
  0x33   :  { %238 = vmatpush3.bf16.msra.mxu0 %v237_v27 }
  0x36   :  { %213 = vmatmul.mubr.f32.vlgmr.msra.gmra.mrb[0].mxu0 %v35_v28 }
  0x96   :  { %v57_v30 = vpop.permute.xlu0 %56 }
  0x97   :  { %v65_v31 = vmul.f32 %v161_v29, %v57_v30 }
 0x109   :  { %v132_v32 = vpop.f32.mrb[0].mxu0 }
 0x10a   :  { %v133_v34 = vadd.f32 %v132_v32, %v65_v31  ;;  %v214_v35 = vpop.f32.mrb[1].mxu0 }
 0x10c   :  { %v143_v36 = vadd.f32 %v162_v33, %v133_v34 }
 0x10e   :  { %248 = vtanh.f32 %v143_v36 }
 0x118   :  { %v249_v37 = vpop.eup %248 }
 0x119   :  { %145 = vst [vmem:[#allocation5] sm:$0xff] %v249_v37 }
 0x11a   :  { %283 = shalt.err (!%p280_p12)
}
 0x11b   :  { %s284_s4 = scalar_lea.hbm %s377_s5, 128 }
 0x11c   :  { %p285_p13 = scmp.ne.s32.totalorder %s377_s5, %s284_s4  ;;  %p288_p0 = scmp.lt.u32.totalorder %s284_s4, %s377_s5 }
 0x11e   :  { %p290_p1 = pnand %p288_p0, %p285_p13 }
 0x120   :  { %293 = shalt.err (!%p290_p1)
}
 0x121   :  { %155 = dma.vmem_to_hbm [thread:$0]  %s153_s14, 128, %s377_s5, [#allocation4]  }
 0x122   :  { %296 = dma.done.wait [#allocation4], 128  }
 0x123   :  { %297 = vsyncadd [#allocation4], 4294967168 }
 0x124   :  { %159 = vsyncpa [#allocation3], 1 }
 0x125   :  { %160 = vsyncpa [#allocation4], 1 }

</bundles_post_ra>
